<compile_context>
chip_gen: v7x
topology: tpu7x:2x2x1
jax: 0.10.0
libtpu: 0.0.40
codegen_flags: <defaults>
</compile_context>

<pallas_src>
import jax
import jax.numpy as jnp
from jax.experimental import pallas as pl
from jax.experimental.pallas import tpu as pltpu

K_PAD = 128  # pad the class axis to one full lane group


def class_energy_kernel(x_ref, w_ref, b_ref, wt_ref, out_ref, acc_ref):
    # x_ref:  (TN, TD)    bf16 image tile
    # w_ref:  (TD, K_PAD) bf16 sign-folded classifier weights tile
    # b_ref:  (1, K_PAD)  f32 sign-folded biases
    # wt_ref: (1, K_PAD)  f32 per-head loss weights (0 on padded columns)
    # out_ref:(TN, 1)     f32 per-sample energy
    # acc_ref:(TN, K_PAD) f32 logit accumulator (VMEM scratch)
    k = pl.program_id(1)

    @pl.when(k == 0)
    def _init():
        acc_ref[...] = jnp.zeros_like(acc_ref)

    # Pure MXU accumulate over the D reduction axis.
    acc_ref[...] += jnp.dot(x_ref[...], w_ref[...],
                            preferred_element_type=jnp.float32)

    @pl.when(k == pl.num_programs(1) - 1)
    def _epilogue():
        logits = acc_ref[...] + b_ref[...]                  # (TN, K_PAD) f32
        prob = jax.nn.sigmoid(logits)
        # Binary targets already sign-folded into w/b, so a single branch-free
        # form covers both cases; padded columns have wt == 0 -> contribute 0.
        loss = -jnp.log(prob + 1e-8) * wt_ref[...]
        out_ref[...] = jnp.sum(loss, axis=1, keepdims=True)  # (TN, 1)


def _round_up(x, m):
    return ((x + m - 1) // m) * m


def class_energy(img, weight, bias, binaries, class_weights,
                 *, tn=128, td=1024, compute_dtype=jnp.bfloat16):
    """img: (N, C, H, W).  weight: (D, K), bias/binaries/class_weights: (K,)."""
    N = img.shape[0]
    D, K = weight.shape
    assert K <= K_PAD, "more than 128 classifier heads not supported"

    # Tile sizes: lane-aligned, clamped to the (padded) problem size.
    d_aligned = _round_up(D, 128)
    td = min(td, d_aligned)
    d_pad = _round_up(D, td)
    n_pad = _round_up(N, tn)

    # ---- host-side prep (frozen params, done once) --------------------------
    # Fold binary targets into the weights/bias: 1 - sigmoid(z) == sigmoid(-z).
    sign = jnp.where(binaries.astype(jnp.float32) > 0.5, 1.0, -1.0)       # (K,)

    x = jnp.zeros((n_pad, d_pad), jnp.float32).at[:N, :D].set(
        img.reshape(N, D).astype(jnp.float32))
    w = jnp.zeros((d_pad, K_PAD), jnp.float32).at[:D, :K].set(
        weight.astype(jnp.float32) * sign[None, :])
    b = jnp.zeros((1, K_PAD), jnp.float32).at[0, :K].set(
        bias.astype(jnp.float32) * sign)
    wt = jnp.zeros((1, K_PAD), jnp.float32).at[0, :K].set(
        class_weights.astype(jnp.float32))            # pads are exactly 0.0

    # bf16 stream for the matmul inputs; epilogue params stay f32.
    x = x.astype(compute_dtype)
    w = w.astype(compute_dtype)

    grid = (n_pad // tn, d_pad // td)  # N tiles (parallel), D tiles (reduction, last)

    out = pl.pallas_call(
        class_energy_kernel,
        out_shape=jax.ShapeDtypeStruct((n_pad, 1), jnp.float32),
        grid_spec=pltpu.PrefetchScalarGridSpec(
            num_scalar_prefetch=0,
            grid=grid,
            in_specs=[
                pl.BlockSpec((tn, td), lambda i, k: (i, k)),      # x tile
                pl.BlockSpec((td, K_PAD), lambda i, k: (k, 0)),   # w tile
                pl.BlockSpec((1, K_PAD), lambda i, k: (0, 0)),    # bias
                pl.BlockSpec((1, K_PAD), lambda i, k: (0, 0)),    # class weights
            ],
            out_specs=pl.BlockSpec((tn, 1), lambda i, k: (i, 0)),
            scratch_shapes=[pltpu.VMEM((tn, K_PAD), jnp.float32)],
        ),
        compiler_params=pltpu.CompilerParams(
            dimension_semantics=("parallel", "arbitrary"),
            vmem_limit_bytes=32 * 1024 * 1024,
        ),
    )(x, w, b, wt)

    return out[:N, 0]


if __name__ == "__main__":
    key = jax.random.PRNGKey(0)
    N, C, H, W = 2, 4, 16, 16
    D = C * H * W

    # Module configuration: 3 frozen classifiers with binary targets & weights.
    binaries = jnp.array([1.0, 0.0, 1.0], dtype=jnp.float32)
    class_weights = jnp.array([1.0, 0.5, 2.0], dtype=jnp.float32)
    K = binaries.shape[0]

    k_img, k_w, k_b = jax.random.split(key, 3)
    img = jax.random.normal(k_img, (N, C, H, W), dtype=jnp.float32)
    # Deterministic synthetic frozen classifier parameters.
    cls_weight = jax.random.normal(k_w, (D, K), dtype=jnp.float32) * 0.02
    cls_bias = jax.random.normal(k_b, (K,), dtype=jnp.float32) * 0.1

    out = class_energy(img, cls_weight, cls_bias, binaries, class_weights)
    out = jax.block_until_ready(out)

    # Pure-JAX reference of the original module semantics, at matched input
    # precision (bf16 matmul inputs, f32 math) to mirror the kernel's stream.
    x_ref = img.reshape(N, D).astype(jnp.bfloat16).astype(jnp.float32)
    w_ref = cls_weight.astype(jnp.bfloat16).astype(jnp.float32)
    logits_ref = x_ref @ w_ref + cls_bias
    prob_ref = jax.nn.sigmoid(logits_ref)
    p_ref = jnp.where(binaries > 0.5, prob_ref, 1.0 - prob_ref)
    energy_ref = jnp.sum(-jnp.log(p_ref + 1e-8) * class_weights, axis=1)

    assert out.shape == (N,)
    assert jnp.allclose(out, energy_ref, atol=1e-4, rtol=1e-4), (out, energy_ref)

    print("KERNEL_OK")
</pallas_src>

<mosaic_0001>
module attributes {stable_mosaic.version = 11 : i64} {
  func.func @class_energy_kernel(%arg0: i32, %arg1: i32, %arg2: memref<128x1024xbf16, #tpu.memory_space<vmem>>, %arg3: memref<1024x128xbf16, #tpu.memory_space<vmem>>, %arg4: memref<1x128xf32, #tpu.memory_space<vmem>>, %arg5: memref<1x128xf32, #tpu.memory_space<vmem>>, %arg6: memref<128x1xf32, #tpu.memory_space<vmem>>, %arg7: memref<128x128xf32, #tpu.memory_space<vmem>>) attributes {dimension_semantics = [#tpu.dimension_semantics<parallel>, #tpu.dimension_semantics<arbitrary>], iteration_bounds = array<i64: 1, 1>, scalar_prefetch = 0 : i64, scratch_operands = 1 : i64, tpu.core_type = #tpu.core_type<tc>, window_params = [{transform_indices = @transform_0, window_bounds = array<i64: 128, 1024>}, {transform_indices = @transform_1, window_bounds = array<i64: 1024, 128>}, {pipeline_mode = #tpu.pipeline_mode<synchronous>, transform_indices = @transform_2, window_bounds = array<i64: 1, 128>}, {pipeline_mode = #tpu.pipeline_mode<synchronous>, transform_indices = @transform_3, window_bounds = array<i64: 1, 128>}, {transform_indices = @transform_4, window_bounds = array<i64: 128, 1>}]} {
    %c0_i32 = arith.constant 0 : i32
    %0 = arith.cmpi eq, %arg1, %c0_i32 : i32
    %1 = arith.extui %0 : i1 to i32
    %c0_i32_0 = arith.constant 0 : i32
    %2 = arith.cmpi ne, %1, %c0_i32_0 : i32
    scf.if %2 {
      %cst_10 = arith.constant 0.000000e+00 : f32
      %12 = vector.broadcast %cst_10 : f32 to vector<128x128xf32>
      %c0_11 = arith.constant 0 : index
      %c0_12 = arith.constant 0 : index
      %13 = vector.load %arg7[%c0_11, %c0_12] : memref<128x128xf32, #tpu.memory_space<vmem>>, vector<128x128xf32>
      tpu.vector_store %arg7[%c0_11, %c0_12], %12 {strides = array<i32>} : memref<128x128xf32, #tpu.memory_space<vmem>>, vector<128x128xf32>,
    } else {
    }
    %c0 = arith.constant 0 : index
    %c0_1 = arith.constant 0 : index
    %3 = vector.load %arg7[%c0, %c0_1] : memref<128x128xf32, #tpu.memory_space<vmem>>, vector<128x128xf32>
    %c0_2 = arith.constant 0 : index
    %c0_3 = arith.constant 0 : index
    %4 = vector.load %arg2[%c0_2, %c0_3] : memref<128x1024xbf16, #tpu.memory_space<vmem>>, vector<128x1024xbf16>
    %c0_4 = arith.constant 0 : index
    %c0_5 = arith.constant 0 : index
    %5 = vector.load %arg3[%c0_4, %c0_5] : memref<1024x128xbf16, #tpu.memory_space<vmem>>, vector<1024x128xbf16>
    %cst = arith.constant dense<0.000000e+00> : vector<128x128xf32>
    %6 = tpu.matmul %4, %5, %cst {dimension_numbers = #tpu.dot_dimension_numbers<[1], [0], [0], [1], [0, 0, 1, 1], [], []>} : vector<128x1024xbf16>, vector<1024x128xbf16>, vector<128x128xf32> -> vector<128x128xf32>
    %7 = arith.addf %3, %6 : vector<128x128xf32>
    %c0_6 = arith.constant 0 : index
    %c0_7 = arith.constant 0 : index
    %8 = vector.load %arg7[%c0_6, %c0_7] : memref<128x128xf32, #tpu.memory_space<vmem>>, vector<128x128xf32>
    tpu.vector_store %arg7[%c0_6, %c0_7], %7 {strides = array<i32>} : memref<128x128xf32, #tpu.memory_space<vmem>>, vector<128x128xf32>,
    %c0_i32_8 = arith.constant 0 : i32
    %9 = arith.cmpi eq, %arg1, %c0_i32_8 : i32
    %10 = arith.extui %9 : i1 to i32
    %c0_i32_9 = arith.constant 0 : i32
    %11 = arith.cmpi ne, %10, %c0_i32_9 : i32
    scf.if %11 {
      %c0_10 = arith.constant 0 : index
      %c0_11 = arith.constant 0 : index
      %12 = vector.load %arg7[%c0_10, %c0_11] : memref<128x128xf32, #tpu.memory_space<vmem>>, vector<128x128xf32>
      %c0_12 = arith.constant 0 : index
      %c0_13 = arith.constant 0 : index
      %13 = vector.load %arg4[%c0_12, %c0_13] : memref<1x128xf32, #tpu.memory_space<vmem>>, vector<1x128xf32>
      %14 = vector.broadcast %13 : vector<1x128xf32> to vector<128x128xf32>
      %15 = arith.addf %12, %14 : vector<128x128xf32>
      %16 = arith.negf %15 : vector<128x128xf32>
      %17 = math.exp %16 : vector<128x128xf32>
      %cst_14 = arith.constant 1.000000e+00 : f32
      %18 = vector.broadcast %cst_14 : f32 to vector<128x128xf32>
      %19 = arith.addf %18, %17 : vector<128x128xf32>
      %20 = arith.divf %18, %19 : vector<128x128xf32>
      %cst_15 = arith.constant 9.99999993E-9 : f32
      %21 = vector.broadcast %cst_15 : f32 to vector<128x128xf32>
      %22 = arith.addf %20, %21 : vector<128x128xf32>
      %23 = math.log %22 : vector<128x128xf32>
      %cst_16 = arith.constant 0.000000e+00 : f32
      %24 = vector.broadcast %cst_16 : f32 to vector<128x128xf32>
      %25 = arith.subf %24, %23 : vector<128x128xf32>
      %c0_17 = arith.constant 0 : index
      %c0_18 = arith.constant 0 : index
      %26 = vector.load %arg5[%c0_17, %c0_18] : memref<1x128xf32, #tpu.memory_space<vmem>>, vector<1x128xf32>
      %27 = vector.broadcast %26 : vector<1x128xf32> to vector<128x128xf32>
      %28 = arith.mulf %25, %27 : vector<128x128xf32>
      %cst_19 = arith.constant dense<0.000000e+00> : vector<128xf32>
      %29 = vector.multi_reduction <add>, %28, %cst_19 [1] : vector<128x128xf32> to vector<128xf32>
      %30 = vector.shape_cast %29 : vector<128xf32> to vector<128x1xf32>
      %c0_20 = arith.constant 0 : index
      %c0_21 = arith.constant 0 : index
      %31 = vector.load %arg6[%c0_20, %c0_21] : memref<128x1xf32, #tpu.memory_space<vmem>>, vector<128x1xf32>
      tpu.vector_store %arg6[%c0_20, %c0_21], %30 {strides = array<i32>} : memref<128x1xf32, #tpu.memory_space<vmem>>, vector<128x1xf32>,
    } else {
    }
    return
  }
  func.func @transform_0(%arg0: i32, %arg1: i32) -> (i32, i32) {
    %c0_i32 = arith.constant 0 : i32
    return %arg0, %arg1 : i32, i32
  }
  func.func @transform_1(%arg0: i32, %arg1: i32) -> (i32, i32) {
    %c0_i32 = arith.constant 0 : i32
    %c0_i32_0 = arith.constant 0 : i32
    return %arg1, %c0_i32 : i32, i32
  }
  func.func @transform_2(%arg0: i32, %arg1: i32) -> (i32, i32) {
    %c0_i32 = arith.constant 0 : i32
    %c0_i32_0 = arith.constant 0 : i32
    %c0_i32_1 = arith.constant 0 : i32
    return %c0_i32, %c0_i32_0 : i32, i32
  }
  func.func @transform_3(%arg0: i32, %arg1: i32) -> (i32, i32) {
    %c0_i32 = arith.constant 0 : i32
    %c0_i32_0 = arith.constant 0 : i32
    %c0_i32_1 = arith.constant 0 : i32
    return %c0_i32, %c0_i32_0 : i32, i32
  }
  func.func @transform_4(%arg0: i32, %arg1: i32) -> (i32, i32) {
    %c0_i32 = arith.constant 0 : i32
    %c0_i32_0 = arith.constant 0 : i32
    return %arg0, %c0_i32 : i32, i32
  }
}

</mosaic_0001>

<bundles_post_ra>
// kernel: tpu_custom_call.1
= control target key start
LH: loop header
LB: loop body
LE: loop exit
PB: predicated region body
PF: predicated region fallthrough
CT: control target
= control target key end

     0   :  { %9 = vsyncpa [#allocation4], 0  ;;  %s2503_s0 = inlined_call_operand.hbm [shape: bf16[128,1024], index: 0, kind: input, shape index: {}]   ;;  %s2504_s1 = inlined_call_operand.hbm [shape: bf16[1024,128], index: 1, kind: input, shape index: {}]   ;;  %s2505_s2 = inlined_call_operand.vmem [shape: f32[1,128], index: 2, kind: input, shape index: {}]   ;;  %s2506_s3 = inlined_call_operand.vmem [shape: f32[1,128], index: 3, kind: input, shape index: {}]   ;;  %s2507_s4 = inlined_call_operand.vmem [shape: f32[128,1], index: 4, kind: output, shape index: {}]  }
   0x1   :  { %10 = vsyncpa [#allocation6], 0  ;;  %s2294_s15 = smov [#allocation3]   ;;  %s2246_s19 = scalar_lea.hbm %s2503_s0, 8192 }
   0x2   :  { %s16_s16 = sshll.u32 %s2294_s15, 4  ;;  %p2247_p0 = scmp.ne.s32.totalorder %s2503_s0, %s2246_s19  ;;  %s17_s16 = int_to_ptr.vmem [resolvable:$true] %s16_s16 }
   0x3   :  { %p2250_p1 = scmp.lt.u32.totalorder %s2246_s19, %s2503_s0 }
   0x5   :  { %p2252_p2 = pnand %p2250_p1, %p2247_p0 }
   0x7   :  { %2255 = shalt.err (!%p2252_p2)
}
   0x8   :  { %s2256_s24 = scalar_lea.vmem %s17_s16, 8192  ;;  %p2261_p4 = scmp.lt.s32.totalorder %s17_s16, %s17_s16 }
   0x9   :  { %p2257_p3 = scmp.ne.s32.totalorder %s17_s16, %s2256_s24  ;;  %p2262_p5 = scmp.lt.s32.totalorder %s2256_s24, %s2256_s24 }
   0xb   :  { %p2263_p6 = por %p2262_p5, %p2261_p4 }
   0xd   :  { %p2264_p7 = pnand %p2263_p6, %p2257_p3 }
   0xf   :  { %2267 = shalt.err (!%p2264_p7)
}
  0x10   :  { %s2295_s25 = smov 512   ;;  %s2296_s26 = smov 32  }
  0x11   :  { %22 = dma.hbm_to_vmem [thread:$0]  %s2503_s0, 8192, %s17_s16, [#allocation4], %s2295_s25, %s2295_s25, %s2296_s26  }
  0x12   :  { %s2297_s29 = smov [#allocation5]   ;;  %s2268_s7 = scalar_lea.hbm %s2504_s1, 8192 }
  0x13   :  { %s28_s30 = sshll.u32 %s2297_s29, 4  ;;  %p2269_p8 = scmp.ne.s32.totalorder %s2504_s1, %s2268_s7  ;;  %s29_s30 = int_to_ptr.vmem [resolvable:$true] %s28_s30 }
  0x14   :  { %p2272_p9 = scmp.lt.u32.totalorder %s2268_s7, %s2504_s1 }
  0x16   :  { %p2274_p10 = pnand %p2272_p9, %p2269_p8 }
  0x18   :  { %2277 = shalt.err (!%p2274_p10)
}
  0x19   :  { %s2278_s12 = scalar_lea.vmem %s29_s30, 8192  ;;  %p2283_p12 = scmp.lt.s32.totalorder %s29_s30, %s29_s30 }
  0x1a   :  { %p2279_p11 = scmp.ne.s32.totalorder %s29_s30, %s2278_s12  ;;  %p2284_p13 = scmp.lt.s32.totalorder %s2278_s12, %s2278_s12 }
  0x1c   :  { %p2285_p0 = por %p2284_p13, %p2283_p12 }
  0x1e   :  { %p2286_p1 = pnand %p2285_p0, %p2279_p11 }
  0x20   :  { %2289 = shalt.err (!%p2286_p1)
}
  0x21   :  { %s2298_s0 = smov 64   ;;  %s2299_s13 = smov 4  }
  0x22   :  { %34 = dma.hbm_to_vmem [thread:$0]  %s2504_s1, 8192, %s29_s30, [#allocation6], %s2298_s0, %s2298_s0, %s2299_s13  }
  0x23   :  { %2290 = dma.done.wait [#allocation4], 8192  }
  0x24   :  { %2291 = vsyncadd [#allocation4], 4294959104 }
  0x25   :  { %2292 = dma.done.wait [#allocation6], 8192  }
  0x26   :  { %2293 = vsyncadd [#allocation6], 4294959104  ;;  %v2086_v0 = vld [vmem:[#allocation5 + $0x40] sm:$0xff]   ;;  %v2090_v4 = vld [vmem:[#allocation5 + $0x48] sm:$0xff]   ;;  %vm1655_vm0 = vcmask 7168  }
  0x27   :  { %v2087_v1 = vld [vmem:[#allocation5 + $0xc0] sm:$0xff]   ;;  %1824 = vmatprep.subr.bf16.mxu0 %v2086_v0  ;;  %v2091_v5 = vld [vmem:[#allocation5 + $0xc8] sm:$0xff]   ;;  %v2094_v8 = vld [vmem:[#allocation5 + $0x50] sm:$0xff]  }
  0x28   :  { %v2088_v2 = vld [vmem:[#allocation5] sm:$0xff]   ;;  %1888 = vmatprep.subr.bf16.mxu1 %v2087_v1  ;;  %v2092_v6 = vld [vmem:[#allocation5 + $0x8] sm:$0xff]   ;;  %v2095_v9 = vld [vmem:[#allocation5 + $0xd0] sm:$0xff]  }
  0x29   :  { %v2089_v3 = vld [vmem:[#allocation5 + $0x80] sm:$0xff]   ;;  %1825 = vmatpush3.bf16.msra.mxu0 %v2088_v2  ;;  %v2093_v7 = vld [vmem:[#allocation5 + $0x88] sm:$0xff]   ;;  %v2096_v10 = vld [vmem:[#allocation5 + $0x10] sm:$0xff]  }
  0x2a   :  { %1889 = vmatpush3.bf16.msra.mxu1 %v2089_v3  ;;  %1826 = vmatprep.subr.bf16.mxu0 %v2090_v4  ;;  %v2097_v11 = vld [vmem:[#allocation5 + $0x90] sm:$0xff]   ;;  %v2098_v12 = vld [vmem:[#allocation5 + $0x58] sm:$0xff]   ;;  %v2102_v16 = vld [vmem:[#allocation5 + $0x60] sm:$0xff]  }
  0x2b   :  { %1890 = vmatprep.subr.bf16.mxu1 %v2091_v5  ;;  %v2099_v13 = vld [vmem:[#allocation5 + $0xd8] sm:$0xff]   ;;  %v2103_v17 = vld [vmem:[#allocation5 + $0xe0] sm:$0xff]   ;;  %v2106_v20 = vld [vmem:[#allocation5 + $0x68] sm:$0xff]  }
  0x2c   :  { %v2100_v14 = vld [vmem:[#allocation5 + $0x18] sm:$0xff]   ;;  %v2104_v18 = vld [vmem:[#allocation5 + $0x20] sm:$0xff]   ;;  %v2107_v21 = vld [vmem:[#allocation5 + $0xe8] sm:$0xff]  }
  0x2d   :  { %1827 = vmatpush3.bf16.msra.mxu0 %v2092_v6  ;;  %v2101_v15 = vld [vmem:[#allocation5 + $0x98] sm:$0xff]   ;;  %v2105_v19 = vld [vmem:[#allocation5 + $0xa0] sm:$0xff]   ;;  %v2108_v22 = vld [vmem:[#allocation5 + $0x28] sm:$0xff]  }
  0x2e   :  { %1891 = vmatpush3.bf16.msra.mxu1 %v2093_v7  ;;  %1828 = vmatprep.subr.bf16.mxu0 %v2094_v8  ;;  %v2109_v23 = vld [vmem:[#allocation5 + $0xa8] sm:$0xff]   ;;  %v2110_v24 = vld [vmem:[#allocation5 + $0x70] sm:$0xff]   ;;  %v2114_v28 = vld [vmem:[#allocation5 + $0x78] sm:$0xff]  }
  0x2f   :  { %1892 = vmatprep.subr.bf16.mxu1 %v2095_v9  ;;  %v2111_v25 = vld [vmem:[#allocation5 + $0xf0] sm:$0xff]   ;;  %v2115_v29 = vld [vmem:[#allocation5 + $0xf8] sm:$0xff]   ;;  %v82_v32 = vld [vmem:[#allocation3] sm:$0xff] }
  0x30   :  { %v2112_v26 = vld [vmem:[#allocation5 + $0x30] sm:$0xff]   ;;  %v2116_v30 = vld [vmem:[#allocation5 + $0x38] sm:$0xff]   ;;  %v86_v33 = vld [vmem:[#allocation3 + $0x20] sm:$0xff] }
  0x31   :  { %1829 = vmatpush3.bf16.msra.mxu0 %v2096_v10  ;;  %v2113_v27 = vld [vmem:[#allocation5 + $0xb0] sm:$0xff]   ;;  %v2117_v31 = vld [vmem:[#allocation5 + $0xb8] sm:$0xff]   ;;  %v83_v34 = vld [vmem:[#allocation3 + $0x8] sm:$0xff]  ;;  %v1678_v35 = vcombine.low %v82_v32, %v86_v33  ;;  %v1679_v36 = vcombine.high %v82_v32, %v86_v33 }
  0x32   :  { %1893 = vmatpush3.bf16.msra.mxu1 %v2097_v11  ;;  %1830 = vmatprep.subr.bf16.mxu0 %v2098_v12  ;;  %v87_v37 = vld [vmem:[#allocation3 + $0x28] sm:$0xff]  ;;  %v2118_v40 = vld [vmem:[#allocation5 + $0x140] sm:$0xff]   ;;  %v2126_v62 = vld [vmem:[#allocation5 + $0x150] sm:$0xff]  }
  0x33   :  { %1894 = vmatprep.subr.bf16.mxu1 %v2099_v13  ;;  %v1680_v38 = vcombine.low %v83_v34, %v87_v37  ;;  %v1681_v39 = vcombine.high %v83_v34, %v87_v37  ;;  %1010 = vmatprep.mubr.bf16.mxu0 %v1679_v36  ;;  %v2119_v41 = vld [vmem:[#allocation5 + $0x100] sm:$0xff]   ;;  %v91_v47 = vld [vmem:[#allocation3 + $0x48] sm:$0xff]  ;;  %v2127_v63 = vld [vmem:[#allocation5 + $0x110] sm:$0xff]  }
  0x34   :  { %v2120_v42 = vld [vmem:[#allocation5 + $0x1c0] sm:$0xff]   ;;  %v95_v48 = vld [vmem:[#allocation3 + $0x68] sm:$0xff]  ;;  %v2128_v0 = vld [vmem:[#allocation5 + $0x1d0] sm:$0xff]  }
  0x35   :  { %1831 = vmatpush3.bf16.msra.mxu0 %v2100_v14  ;;  %1107 = vmatprep.mubr.bf16.mxu1 %v1681_v39  ;;  %v2121_v43 = vld [vmem:[#allocation5 + $0x180] sm:$0xff]   ;;  %v1689_v49 = vcombine.high %v91_v47, %v95_v48  ;;  %v2122_v50 = vld [vmem:[#allocation5 + $0x148] sm:$0xff]   ;;  %v1688_v53 = vcombine.low %v91_v47, %v95_v48  ;;  %v2129_v1 = vld [vmem:[#allocation5 + $0x190] sm:$0xff]  }
  0x36   :  { %1895 = vmatpush3.bf16.msra.mxu1 %v2101_v15  ;;  %1832 = vmatprep.subr.bf16.mxu0 %v2102_v16  ;;  %v90_v44 = vld [vmem:[#allocation3 + $0x40] sm:$0xff]  ;;  %v2123_v52 = vld [vmem:[#allocation5 + $0x108] sm:$0xff]   ;;  %v2130_v10 = vld [vmem:[#allocation5 + $0x158] sm:$0xff]  }
  0x37   :  { %1896 = vmatprep.subr.bf16.mxu1 %v2103_v17  ;;  %v94_v45 = vld [vmem:[#allocation3 + $0x60] sm:$0xff]  ;;  %v2124_v54 = vld [vmem:[#allocation5 + $0x1c8] sm:$0xff]   ;;  %v2131_v11 = vld [vmem:[#allocation5 + $0x118] sm:$0xff]  }
  0x38   :  { %v1687_v46 = vcombine.high %v90_v44, %v94_v45  ;;  %v1686_v51 = vcombine.low %v90_v44, %v94_v45  ;;  %v2125_v55 = vld [vmem:[#allocation5 + $0x188] sm:$0xff]   ;;  %v98_v56 = vld [vmem:[#allocation3 + $0x80] sm:$0xff]  ;;  %v2132_v12 = vld [vmem:[#allocation5 + $0x1d8] sm:$0xff]  }
  0x39   :  { %1833 = vmatpush3.bf16.msra.mxu0 %v2104_v18  ;;  %v102_v57 = vld [vmem:[#allocation3 + $0xa0] sm:$0xff]  ;;  %v99_v58 = vld [vmem:[#allocation3 + $0x88] sm:$0xff]  ;;  %v2133_v13 = vld [vmem:[#allocation5 + $0x198] sm:$0xff]  }
  0x3a   :  { %1897 = vmatpush3.bf16.msra.mxu1 %v2105_v19  ;;  %1834 = vmatprep.subr.bf16.mxu0 %v2106_v20  ;;  %v103_v59 = vld [vmem:[#allocation3 + $0xa8] sm:$0xff]  ;;  %v1695_v60 = vcombine.high %v98_v56, %v102_v57  ;;  %v1694_v2 = vcombine.low %v98_v56, %v102_v57  ;;  %v106_v3 = vld [vmem:[#allocation3 + $0xc0] sm:$0xff]  ;;  %v2143_v39 = vld [vmem:[#allocation5 + $0x130] sm:$0xff]  }
  0x3b   :  { %1898 = vmatprep.subr.bf16.mxu1 %v2107_v21  ;;  %v1697_v61 = vcombine.high %v99_v58, %v103_v59  ;;  %v110_v4 = vld [vmem:[#allocation3 + $0xe0] sm:$0xff]  ;;  %v107_v5 = vld [vmem:[#allocation3 + $0xc8] sm:$0xff]  ;;  %v1696_v6 = vcombine.low %v99_v58, %v103_v59  ;;  %v2147_v48 = vld [vmem:[#allocation5 + $0x138] sm:$0xff]  }
  0x3c   :  { %v1703_v7 = vcombine.high %v106_v3, %v110_v4  ;;  %v111_v8 = vld [vmem:[#allocation3 + $0xe8] sm:$0xff]  ;;  %v114_v14 = vld [vmem:[#allocation3 + $0x100] sm:$0xff]  ;;  %v1702_v19 = vcombine.low %v106_v3, %v110_v4 }
  0x3d   :  { %1835 = vmatpush3.bf16.msra.mxu0 %v2108_v22  ;;  %v1705_v9 = vcombine.high %v107_v5, %v111_v8  ;;  %v118_v15 = vld [vmem:[#allocation3 + $0x120] sm:$0xff]  ;;  %v115_v16 = vld [vmem:[#allocation3 + $0x108] sm:$0xff]  ;;  %v1704_v21 = vcombine.low %v107_v5, %v111_v8  ;;  %v93_v8 = vld [vmem:[#allocation3 + $0x58] sm:$0xff] }
  0x3e   :  { %1899 = vmatpush3.bf16.msra.mxu1 %v2109_v23  ;;  %1836 = vmatprep.subr.bf16.mxu0 %v2110_v24  ;;  %v119_v17 = vld [vmem:[#allocation3 + $0x128] sm:$0xff]  ;;  %v2134_v18 = vld [vmem:[#allocation5 + $0x160] sm:$0xff]   ;;  %v1711_v22 = vcombine.high %v114_v14, %v118_v15  ;;  %v1710_v34 = vcombine.low %v114_v14, %v118_v15  ;;  %v100_v14 = vld [vmem:[#allocation3 + $0x90] sm:$0xff] }
  0x3f   :  { %1900 = vmatprep.subr.bf16.mxu1 %v2111_v25  ;;  %v2135_v20 = vld [vmem:[#allocation5 + $0x120] sm:$0xff]   ;;  %v1713_v24 = vcombine.high %v115_v16, %v119_v17  ;;  %v2140_v32 = vld [vmem:[#allocation5 + $0x1e8] sm:$0xff]   ;;  %v104_v15 = vld [vmem:[#allocation3 + $0xb0] sm:$0xff] }
  0x40   :  { %v2136_v23 = vld [vmem:[#allocation5 + $0x1e0] sm:$0xff]   ;;  %v2141_v33 = vld [vmem:[#allocation5 + $0x1a8] sm:$0xff]  }
  0x41   :  { %1837 = vmatpush3.bf16.msra.mxu0 %v2112_v26  ;;  %v2137_v25 = vld [vmem:[#allocation5 + $0x1a0] sm:$0xff]   ;;  %v131_v44 = vld [vmem:[#allocation3 + $0x188] sm:$0xff] }
  0x42   :  { %1901 = vmatpush3.bf16.msra.mxu1 %v2113_v27  ;;  %1838 = vmatprep.subr.bf16.mxu0 %v2114_v28  ;;  %v122_v26 = vld [vmem:[#allocation3 + $0x140] sm:$0xff]  ;;  %v2138_v28 = vld [vmem:[#allocation5 + $0x168] sm:$0xff]  }
  0x43   :  { %1902 = vmatprep.subr.bf16.mxu1 %v2115_v29  ;;  %v126_v27 = vld [vmem:[#allocation3 + $0x160] sm:$0xff]  ;;  %v123_v29 = vld [vmem:[#allocation3 + $0x148] sm:$0xff] }
  0x44   :  { %v1719_v36 = vcombine.high %v122_v26, %v126_v27  ;;  %v135_v45 = vld [vmem:[#allocation3 + $0x1a8] sm:$0xff]  ;;  %v1718_v47 = vcombine.low %v122_v26, %v126_v27  ;;  %v1698_v26 = vcombine.low %v100_v14, %v104_v15 }
  0x45   :  { %1839 = vmatpush3.bf16.msra.mxu0 %v2116_v30  ;;  %v127_v30 = vld [vmem:[#allocation3 + $0x168] sm:$0xff]  ;;  %v1728_v59 = vcombine.low %v131_v44, %v135_v45 }
  0x46   :  { %1903 = vmatpush3.bf16.msra.mxu1 %v2117_v31  ;;  %1952 = vmatprep.subr.bf16.mxu0 %v2118_v40  ;;  %v2139_v31 = vld [vmem:[#allocation5 + $0x128] sm:$0xff]   ;;  %v1721_v37 = vcombine.high %v123_v29, %v127_v30  ;;  %v2144_v40 = vld [vmem:[#allocation5 + $0x1f0] sm:$0xff]  }
  0x47   :  { %2016 = vmatprep.subr.bf16.mxu1 %v2120_v42  ;;  %v134_v42 = vld [vmem:[#allocation3 + $0x1a0] sm:$0xff]  ;;  %v139_v56 = vld [vmem:[#allocation3 + $0x1c8] sm:$0xff] }
  0x48   :  { %1011 = vmatmul.mubr.bf16.vlgmr.msra.gmra.mrb[0].mxu0 %v1678_v35  ;;  %v1712_v35 = vcombine.low %v115_v16, %v119_v17  ;;  %v143_v57 = vld [vmem:[#allocation3 + $0x1e8] sm:$0xff]  ;;  %v101_v16 = vld [vmem:[#allocation3 + $0x98] sm:$0xff] }
  0x49   :  { %1108 = vmatmul.mubr.bf16.vlgmr.msra.gmra.mrb[0].mxu1 %v1680_v38  ;;  %1953 = vmatpush3.bf16.msra.mxu0 %v2119_v41  ;;  %v2142_v38 = vld [vmem:[#allocation5 + $0x170] sm:$0xff]   ;;  %v130_v41 = vld [vmem:[#allocation3 + $0x180] sm:$0xff]  ;;  %v1736_v3 = vcombine.low %v139_v56, %v143_v57  ;;  %v105_v17 = vld [vmem:[#allocation3 + $0xb8] sm:$0xff] }
  0x4a   :  { %2017 = vmatpush3.bf16.msra.mxu1 %v2121_v43  ;;  %1018 = vmatprep.mubr.bf16.mxu0 %v1687_v46  ;;  %v2145_v43 = vld [vmem:[#allocation5 + $0x1b0] sm:$0xff]   ;;  %v2146_v46 = vld [vmem:[#allocation5 + $0x178] sm:$0xff]   ;;  %v1726_v58 = vcombine.low %v130_v41, %v134_v42  ;;  %v1700_v27 = vcombine.low %v101_v16, %v105_v17 }
  0x4b   :  { %1115 = vmatprep.mubr.bf16.mxu1 %v1689_v49  ;;  %1954 = vmatprep.subr.bf16.mxu0 %v2122_v50  ;;  %v1720_v49 = vcombine.low %v123_v29, %v127_v30  ;;  %v1727_v50 = vcombine.high %v130_v41, %v134_v42  ;;  %v116_v30 = vld [vmem:[#allocation3 + $0x110] sm:$0xff]  ;;  %v129_v41 = vld [vmem:[#allocation3 + $0x178] sm:$0xff] }
  0x4c   :  { %2018 = vmatprep.subr.bf16.mxu1 %v2124_v54  ;;  %v138_v54 = vld [vmem:[#allocation3 + $0x1c0] sm:$0xff] }
  0x4d   :  { %1955 = vmatpush3.bf16.msra.mxu0 %v2123_v52  ;;  %v1729_v52 = vcombine.high %v131_v44, %v135_v45 }
  0x4e   :  { %2019 = vmatpush3.bf16.msra.mxu1 %v2125_v55  ;;  %1956 = vmatprep.subr.bf16.mxu0 %v2126_v62  ;;  %v142_v55 = vld [vmem:[#allocation3 + $0x1e0] sm:$0xff]  ;;  %v84_v62 = vld [vmem:[#allocation3 + $0x10] sm:$0xff] }
  0x4f   :  { %2020 = vmatprep.subr.bf16.mxu1 %v2128_v0  ;;  %v85_v0 = vld [vmem:[#allocation3 + $0x18] sm:$0xff] }
  0x50   :  { %1019 = vmatmul.mubr.bf16.gmra.mrb[4].mxu0 %v1686_v51  ;;  %v2148_v51 = vld [vmem:[#allocation5 + $0x1f8] sm:$0xff]  }
  0x51   :  { %1116 = vmatmul.mubr.bf16.gmra.mrb[4].mxu1 %v1688_v53  ;;  %1026 = vmatprep.mubr.bf16.mxu0 %v1695_v60  ;;  %v2149_v53 = vld [vmem:[#allocation5 + $0x1b8] sm:$0xff]   ;;  %v1735_v60 = vcombine.high %v138_v54, %v142_v55 }
  0x52   :  { %1123 = vmatprep.mubr.bf16.mxu1 %v1697_v61  ;;  %1957 = vmatpush3.bf16.msra.mxu0 %v2127_v63  ;;  %v1737_v61 = vcombine.high %v139_v56, %v143_v57  ;;  %v88_v63 = vld [vmem:[#allocation3 + $0x30] sm:$0xff]  ;;  %v141_v56 = vld [vmem:[#allocation3 + $0x1d8] sm:$0xff] }
  0x53   :  { %2021 = vmatpush3.bf16.msra.mxu1 %v2129_v1  ;;  %1958 = vmatprep.subr.bf16.mxu0 %v2130_v10  ;;  %v89_v1 = vld [vmem:[#allocation3 + $0x38] sm:$0xff]  ;;  %v1683_v4 = vcombine.high %v84_v62, %v88_v63  ;;  %v1682_v10 = vcombine.low %v84_v62, %v88_v63 }
  0x54   :  { %2022 = vmatprep.subr.bf16.mxu1 %v2132_v12  ;;  %v1685_v5 = vcombine.high %v85_v0, %v89_v1  ;;  %v145_v57 = vld [vmem:[#allocation3 + $0x1f8] sm:$0xff] }
  0x55   :  { %v1740_v63 = vcombine.low %v141_v56, %v145_v57 }
  0x56   :  { %1959 = vmatpush3.bf16.msra.mxu0 %v2131_v11  ;;  %v1684_v11 = vcombine.low %v85_v0, %v89_v1 }
  0x57   :  { %2023 = vmatpush3.bf16.msra.mxu1 %v2133_v13  ;;  %1960 = vmatprep.subr.bf16.mxu0 %v2134_v18 }
  0x58   :  { %1027 = vmatmul.mubr.bf16.gmra.mrb[8].mxu0 %v1694_v2  ;;  %2024 = vmatprep.subr.bf16.mxu1 %v2136_v23  ;;  %v1734_v2 = vcombine.low %v138_v54, %v142_v55  ;;  %v112_v23 = vld [vmem:[#allocation3 + $0xf0] sm:$0xff] }
  0x59   :  { %1124 = vmatmul.mubr.bf16.gmra.mrb[8].mxu1 %v1696_v6  ;;  %1034 = vmatprep.mubr.bf16.mxu0 %v1703_v7  ;;  %v92_v6 = vld [vmem:[#allocation3 + $0x50] sm:$0xff] }
  0x5a   :  { %1131 = vmatprep.mubr.bf16.mxu1 %v1705_v9  ;;  %1961 = vmatpush3.bf16.msra.mxu0 %v2135_v20  ;;  %v96_v7 = vld [vmem:[#allocation3 + $0x70] sm:$0xff]  ;;  %v97_v9 = vld [vmem:[#allocation3 + $0x78] sm:$0xff]  ;;  %v1699_v20 = vcombine.high %v100_v14, %v104_v15 }
  0x5b   :  { %2025 = vmatpush3.bf16.msra.mxu1 %v2137_v25  ;;  %1962 = vmatprep.subr.bf16.mxu0 %v2138_v28  ;;  %v1691_v12 = vcombine.high %v92_v6, %v96_v7  ;;  %v1693_v13 = vcombine.high %v93_v8, %v97_v9  ;;  %v1690_v18 = vcombine.low %v92_v6, %v96_v7  ;;  %v113_v25 = vld [vmem:[#allocation3 + $0xf8] sm:$0xff]  ;;  %v140_v54 = vld [vmem:[#allocation3 + $0x1d0] sm:$0xff] }
  0x5c   :  { %2026 = vmatprep.subr.bf16.mxu1 %v2140_v32  ;;  %v117_v32 = vld [vmem:[#allocation3 + $0x118] sm:$0xff]  ;;  %v144_v55 = vld [vmem:[#allocation3 + $0x1f0] sm:$0xff] }
  0x5d   :  { %v1738_v62 = vcombine.low %v140_v54, %v144_v55 }
  0x5e   :  { %1963 = vmatpush3.bf16.msra.mxu0 %v2139_v31  ;;  %v120_v31 = vld [vmem:[#allocation3 + $0x130] sm:$0xff] }
  0x5f   :  { %2027 = vmatpush3.bf16.msra.mxu1 %v2141_v33  ;;  %1964 = vmatprep.subr.bf16.mxu0 %v2142_v38  ;;  %v121_v33 = vld [vmem:[#allocation3 + $0x138] sm:$0xff]  ;;  %v124_v38 = vld [vmem:[#allocation3 + $0x150] sm:$0xff]  ;;  %v1714_v42 = vcombine.low %v116_v30, %v120_v31 }
  0x60   :  { %1035 = vmatmul.mubr.bf16.gmra.mrb[12].mxu0 %v1702_v19  ;;  %2028 = vmatprep.subr.bf16.mxu1 %v2144_v40  ;;  %v1692_v19 = vcombine.low %v93_v8, %v97_v9  ;;  %v125_v40 = vld [vmem:[#allocation3 + $0x158] sm:$0xff] }
  0x61   :  { %1132 = vmatmul.mubr.bf16.gmra.mrb[12].mxu1 %v1704_v21  ;;  %1042 = vmatprep.mubr.bf16.mxu0 %v1711_v22  ;;  %v1701_v21 = vcombine.high %v101_v16, %v105_v17  ;;  %v108_v22 = vld [vmem:[#allocation3 + $0xd0] sm:$0xff]  ;;  %v1725_v45 = vcombine.high %v125_v40, %v129_v41 }
  0x62   :  { %1139 = vmatprep.mubr.bf16.mxu1 %v1713_v24  ;;  %1965 = vmatpush3.bf16.msra.mxu0 %v2143_v39  ;;  %v109_v24 = vld [vmem:[#allocation3 + $0xd8] sm:$0xff]  ;;  %v1707_v28 = vcombine.high %v108_v22, %v112_v23  ;;  %v128_v39 = vld [vmem:[#allocation3 + $0x170] sm:$0xff] }
  0x63   :  { %2029 = vmatpush3.bf16.msra.mxu1 %v2145_v43  ;;  %1966 = vmatprep.subr.bf16.mxu0 %v2146_v46  ;;  %v1709_v29 = vcombine.high %v109_v24, %v113_v25  ;;  %v1716_v43 = vcombine.low %v117_v32, %v121_v33  ;;  %v1723_v44 = vcombine.high %v124_v38, %v128_v39  ;;  %v132_v46 = vld [vmem:[#allocation3 + $0x190] sm:$0xff] }
  0x64   :  { %2030 = vmatprep.subr.bf16.mxu1 %v2148_v51  ;;  %v1724_v51 = vcombine.low %v125_v40, %v129_v41 }
  0x66   :  { %1967 = vmatpush3.bf16.msra.mxu0 %v2147_v48  ;;  %v133_v48 = vld [vmem:[#allocation3 + $0x198] sm:$0xff] }
  0x67   :  { %2031 = vmatpush3.bf16.msra.mxu1 %v2149_v53 }
  0x68   :  { %1043 = vmatmul.mubr.bf16.gmra.mrb[16].mxu0 %v1710_v34  ;;  %v1706_v34 = vcombine.low %v108_v22, %v112_v23 }
  0x69   :  { %1140 = vmatmul.mubr.bf16.gmra.mrb[16].mxu1 %v1712_v35  ;;  %1050 = vmatprep.mubr.bf16.mxu0 %v1719_v36  ;;  %v1708_v35 = vcombine.low %v109_v24, %v113_v25  ;;  %v1715_v36 = vcombine.high %v116_v30, %v120_v31 }
  0x6a   :  { %1147 = vmatprep.mubr.bf16.mxu1 %v1721_v37  ;;  %v1717_v37 = vcombine.high %v117_v32, %v121_v33 }
  0x70   :  { %1051 = vmatmul.mubr.bf16.gmra.mrb[20].mxu0 %v1718_v47  ;;  %v136_v47 = vld [vmem:[#allocation3 + $0x1b0] sm:$0xff] }
  0x71   :  { %1148 = vmatmul.mubr.bf16.gmra.mrb[20].mxu1 %v1720_v49  ;;  %1058 = vmatprep.mubr.bf16.mxu0 %v1727_v50  ;;  %v137_v49 = vld [vmem:[#allocation3 + $0x1b8] sm:$0xff]  ;;  %v1722_v50 = vcombine.low %v124_v38, %v128_v39 }
  0x72   :  { %1155 = vmatprep.mubr.bf16.mxu1 %v1729_v52  ;;  %v1731_v52 = vcombine.high %v132_v46, %v136_v47  ;;  %v1733_v53 = vcombine.high %v133_v48, %v137_v49 }
  0x78   :  { %1059 = vmatmul.mubr.bf16.gmra.mrb[24].mxu0 %v1726_v58  ;;  %v1730_v58 = vcombine.low %v132_v46, %v136_v47 }
  0x79   :  { %1156 = vmatmul.mubr.bf16.gmra.mrb[24].mxu1 %v1728_v59  ;;  %1066 = vmatprep.mubr.bf16.mxu0 %v1735_v60  ;;  %v1732_v59 = vcombine.low %v133_v48, %v137_v49  ;;  %v1739_v60 = vcombine.high %v140_v54, %v144_v55 }
  0x7a   :  { %1163 = vmatprep.mubr.bf16.mxu1 %v1737_v61  ;;  %v1741_v61 = vcombine.high %v141_v56, %v145_v57 }
  0x80   :  { %1067 = vmatmul.mubr.bf16.gmra.mrb[28].mxu0 %v1734_v2 }
  0x81   :  { %1164 = vmatmul.mubr.bf16.gmra.mrb[28].mxu1 %v1736_v3  ;;  %1204 = vmatprep.mubr.bf16.mxu0 %v1683_v4 }
  0x82   :  { %1301 = vmatprep.mubr.bf16.mxu1 %v1685_v5 }
  0x88   :  { %1205 = vmatmul.mubr.bf16.vlgmr.msra.gmra.mrb[32].mxu0 %v1682_v10 }
  0x89   :  { %1302 = vmatmul.mubr.bf16.vlgmr.msra.gmra.mrb[32].mxu1 %v1684_v11  ;;  %1212 = vmatprep.mubr.bf16.mxu0 %v1691_v12 }
  0x8a   :  { %1309 = vmatprep.mubr.bf16.mxu1 %v1693_v13 }
  0x90   :  { %1213 = vmatmul.mubr.bf16.gmra.mrb[36].mxu0 %v1690_v18 }
  0x91   :  { %1310 = vmatmul.mubr.bf16.gmra.mrb[36].mxu1 %v1692_v19  ;;  %1220 = vmatprep.mubr.bf16.mxu0 %v1699_v20 }
  0x92   :  { %1317 = vmatprep.mubr.bf16.mxu1 %v1701_v21 }
  0x98   :  { %1221 = vmatmul.mubr.bf16.gmra.mrb[40].mxu0 %v1698_v26 }
  0x99   :  { %1318 = vmatmul.mubr.bf16.gmra.mrb[40].mxu1 %v1700_v27  ;;  %1228 = vmatprep.mubr.bf16.mxu0 %v1707_v28 }
  0x9a   :  { %1325 = vmatprep.mubr.bf16.mxu1 %v1709_v29 }
  0xa0   :  { %1229 = vmatmul.mubr.bf16.gmra.mrb[44].mxu0 %v1706_v34 }
  0xa1   :  { %1326 = vmatmul.mubr.bf16.gmra.mrb[44].mxu1 %v1708_v35  ;;  %1236 = vmatprep.mubr.bf16.mxu0 %v1715_v36 }
  0xa2   :  { %1333 = vmatprep.mubr.bf16.mxu1 %v1717_v37 }
  0xa8   :  { %1237 = vmatmul.mubr.bf16.gmra.mrb[48].mxu0 %v1714_v42 }
  0xa9   :  { %1334 = vmatmul.mubr.bf16.gmra.mrb[48].mxu1 %v1716_v43  ;;  %1244 = vmatprep.mubr.bf16.mxu0 %v1723_v44 }
  0xaa   :  { %1341 = vmatprep.mubr.bf16.mxu1 %v1725_v45 }
  0xb0   :  { %1245 = vmatmul.mubr.bf16.gmra.mrb[52].mxu0 %v1722_v50 }
  0xb1   :  { %1342 = vmatmul.mubr.bf16.gmra.mrb[52].mxu1 %v1724_v51  ;;  %1252 = vmatprep.mubr.bf16.mxu0 %v1731_v52 }
  0xb2   :  { %1349 = vmatprep.mubr.bf16.mxu1 %v1733_v53 }
  0xb8   :  { %1253 = vmatmul.mubr.bf16.gmra.mrb[56].mxu0 %v1730_v58 }
  0xb9   :  { %1350 = vmatmul.mubr.bf16.gmra.mrb[56].mxu1 %v1732_v59  ;;  %1260 = vmatprep.mubr.bf16.mxu0 %v1739_v60 }
  0xba   :  { %1357 = vmatprep.mubr.bf16.mxu1 %v1741_v61 }
  0xc0   :  { %1261 = vmatmul.mubr.bf16.gmra.mrb[60].mxu0 %v1738_v62 }
  0xc1   :  { %1358 = vmatmul.mubr.bf16.gmra.mrb[60].mxu1 %v1740_v63 }
 0x11b   :  { %v1840_v0 = vpop.f32.mrb[0].mxu0 }
 0x11c   :  { %v1904_v1 = vpop.f32.mrb[0].mxu1  ;;  %v1841_v2 = vpop.f32.mrb[1].mxu0 }
 0x11d   :  { %v1842_v3 = vadd.f32 %v1841_v2, %v1840_v0  ;;  %v1905_v4 = vpop.f32.mrb[1].mxu1  ;;  %v1843_v5 = vpop.f32.mrb[2].mxu0 }
 0x11e   :  { %v1906_v6 = vadd.f32 %v1905_v4, %v1904_v1  ;;  %v1907_v7 = vpop.f32.mrb[2].mxu1  ;;  %v1844_v8 = vpop.f32.mrb[3].mxu0 }
 0x11f   :  { %v1845_v9 = vadd.f32 %v1844_v8, %v1843_v5  ;;  %v1908_v10 = vpop.f32.mrb[3].mxu1 }
 0x120   :  { %v2349_v11 = vadd.f32 %v1906_v6, %v1842_v3  ;;  %v1909_v12 = vadd.f32 %v1908_v10, %v1907_v7 }
 0x122   :  { %v2351_v13 = vadd.f32 %v1909_v12, %v1845_v9 }
 0x123   :  { %v1846_v14 = vpop.f32.mrb[4].mxu0 }
 0x124   :  { %v1910_v15 = vpop.f32.mrb[4].mxu1  ;;  %v1847_v16 = vpop.f32.mrb[5].mxu0 }
 0x125   :  { %v1848_v17 = vadd.f32 %v1847_v16, %v1846_v14  ;;  %v1911_v18 = vpop.f32.mrb[5].mxu1  ;;  %v1849_v19 = vpop.f32.mrb[6].mxu0 }
 0x126   :  { %v1912_v20 = vadd.f32 %v1911_v18, %v1910_v15  ;;  %v1913_v21 = vpop.f32.mrb[6].mxu1  ;;  %v1850_v22 = vpop.f32.mrb[7].mxu0 }
 0x127   :  { %v1851_v23 = vadd.f32 %v1850_v22, %v1849_v19  ;;  %v1914_v24 = vpop.f32.mrb[7].mxu1 }
 0x128   :  { %v2353_v25 = vadd.f32 %v1912_v20, %v1848_v17  ;;  %v1915_v26 = vadd.f32 %v1914_v24, %v1913_v21 }
 0x12a   :  { %v2355_v27 = vadd.f32 %v1915_v26, %v1851_v23 }
 0x12b   :  { %v1852_v28 = vpop.f32.mrb[8].mxu0 }
 0x12c   :  { %v1916_v29 = vpop.f32.mrb[8].mxu1  ;;  %v1853_v30 = vpop.f32.mrb[9].mxu0 }
 0x12d   :  { %v1854_v31 = vadd.f32 %v1853_v30, %v1852_v28  ;;  %v1917_v32 = vpop.f32.mrb[9].mxu1  ;;  %v1855_v33 = vpop.f32.mrb[10].mxu0 }
 0x12e   :  { %v1918_v34 = vadd.f32 %v1917_v32, %v1916_v29  ;;  %v1919_v35 = vpop.f32.mrb[10].mxu1  ;;  %v1856_v36 = vpop.f32.mrb[11].mxu0 }
 0x12f   :  { %v1857_v37 = vadd.f32 %v1856_v36, %v1855_v33  ;;  %v1920_v38 = vpop.f32.mrb[11].mxu1 }
 0x130   :  { %v2357_v39 = vadd.f32 %v1918_v34, %v1854_v31  ;;  %v1921_v40 = vadd.f32 %v1920_v38, %v1919_v35 }
 0x132   :  { %v2359_v41 = vadd.f32 %v1921_v40, %v1857_v37 }
 0x133   :  { %v1858_v42 = vpop.f32.mrb[12].mxu0 }
 0x134   :  { %v1922_v43 = vpop.f32.mrb[12].mxu1  ;;  %v1859_v44 = vpop.f32.mrb[13].mxu0 }
 0x135   :  { %v1860_v45 = vadd.f32 %v1859_v44, %v1858_v42  ;;  %v1923_v46 = vpop.f32.mrb[13].mxu1  ;;  %v1861_v47 = vpop.f32.mrb[14].mxu0 }
 0x136   :  { %v1924_v48 = vadd.f32 %v1923_v46, %v1922_v43  ;;  %v1925_v49 = vpop.f32.mrb[14].mxu1  ;;  %v1862_v50 = vpop.f32.mrb[15].mxu0 }
 0x137   :  { %v1863_v51 = vadd.f32 %v1862_v50, %v1861_v47  ;;  %v1926_v52 = vpop.f32.mrb[15].mxu1 }
 0x138   :  { %v2361_v53 = vadd.f32 %v1924_v48, %v1860_v45  ;;  %v1927_v54 = vadd.f32 %v1926_v52, %v1925_v49 }
 0x13a   :  { %v2363_v55 = vadd.f32 %v1927_v54, %v1863_v51 }
 0x13b   :  { %v1864_v56 = vpop.f32.mrb[16].mxu0 }
 0x13c   :  { %v1928_v57 = vpop.f32.mrb[16].mxu1  ;;  %v1865_v58 = vpop.f32.mrb[17].mxu0 }
 0x13d   :  { %v1866_v59 = vadd.f32 %v1865_v58, %v1864_v56  ;;  %v1929_v60 = vpop.f32.mrb[17].mxu1  ;;  %v1867_v61 = vpop.f32.mrb[18].mxu0 }
 0x13e   :  { %v1930_v62 = vadd.f32 %v1929_v60, %v1928_v57  ;;  %v1931_v63 = vpop.f32.mrb[18].mxu1  ;;  %v1868_v0 = vpop.f32.mrb[19].mxu0 }
 0x13f   :  { %v1869_v1 = vadd.f32 %v1868_v0, %v1867_v61  ;;  %v1932_v2 = vpop.f32.mrb[19].mxu1 }
 0x140   :  { %v2365_v3 = vadd.f32 %v1930_v62, %v1866_v59  ;;  %v1933_v4 = vadd.f32 %v1932_v2, %v1931_v63 }
 0x142   :  { %v2367_v5 = vadd.f32 %v1933_v4, %v1869_v1 }
 0x143   :  { %v1870_v6 = vpop.f32.mrb[20].mxu0 }
 0x144   :  { %v1934_v7 = vpop.f32.mrb[20].mxu1  ;;  %v1871_v8 = vpop.f32.mrb[21].mxu0 }
 0x145   :  { %v1872_v9 = vadd.f32 %v1871_v8, %v1870_v6  ;;  %v1935_v10 = vpop.f32.mrb[21].mxu1  ;;  %v1873_v12 = vpop.f32.mrb[22].mxu0  ;;  %v2385_v6 = vld [vmem:[%s2505_s2] ss:$0 sm:$0xff] }
 0x146   :  { %v1936_v14 = vadd.f32 %v1935_v10, %v1934_v7  ;;  %v1937_v15 = vpop.f32.mrb[22].mxu1  ;;  %v1874_v16 = vpop.f32.mrb[23].mxu0 }
 0x147   :  { %v1875_v17 = vadd.f32 %v1874_v16, %v1873_v12  ;;  %v1938_v18 = vpop.f32.mrb[23].mxu1 }
 0x148   :  { %v2369_v19 = vadd.f32 %v1936_v14, %v1872_v9  ;;  %v1939_v20 = vadd.f32 %v1938_v18, %v1937_v15 }
 0x14a   :  { %v2371_v21 = vadd.f32 %v1939_v20, %v1875_v17 }
 0x14b   :  { %v1876_v22 = vpop.f32.mrb[24].mxu0 }
 0x14c   :  { %v1940_v23 = vpop.f32.mrb[24].mxu1  ;;  %v1877_v24 = vpop.f32.mrb[25].mxu0 }
 0x14d   :  { %v1878_v26 = vadd.f32 %v1877_v24, %v1876_v22  ;;  %v1941_v28 = vpop.f32.mrb[25].mxu1  ;;  %v1879_v29 = vpop.f32.mrb[26].mxu0 }
 0x14e   :  { %v1942_v30 = vadd.f32 %v1941_v28, %v1940_v23  ;;  %v1943_v31 = vpop.f32.mrb[26].mxu1  ;;  %v1880_v32 = vpop.f32.mrb[27].mxu0 }
 0x14f   :  { %v1881_v33 = vadd.f32 %v1880_v32, %v1879_v29  ;;  %v1944_v34 = vpop.f32.mrb[27].mxu1 }
 0x150   :  { %v2373_v35 = vadd.f32 %v1942_v30, %v1878_v26  ;;  %v1945_v36 = vadd.f32 %v1944_v34, %v1943_v31 }
 0x152   :  { %v2375_v37 = vadd.f32 %v1945_v36, %v1881_v33 }
 0x153   :  { %v1882_v38 = vpop.f32.mrb[28].mxu0 }
 0x154   :  { %v1946_v40 = vpop.f32.mrb[28].mxu1  ;;  %v1883_v42 = vpop.f32.mrb[29].mxu0 }
 0x155   :  { %v1884_v43 = vadd.f32 %v1883_v42, %v1882_v38  ;;  %v1947_v44 = vpop.f32.mrb[29].mxu1  ;;  %v1885_v45 = vpop.f32.mrb[30].mxu0 }
 0x156   :  { %v1948_v46 = vadd.f32 %v1947_v44, %v1946_v40  ;;  %v1949_v47 = vpop.f32.mrb[30].mxu1  ;;  %v1886_v48 = vpop.f32.mrb[31].mxu0 }
 0x157   :  { %v1887_v49 = vadd.f32 %v1886_v48, %v1885_v45  ;;  %v1950_v50 = vpop.f32.mrb[31].mxu1 }
 0x158   :  { %v2377_v51 = vadd.f32 %v1948_v46, %v1884_v43  ;;  %v1951_v52 = vadd.f32 %v1950_v50, %v1949_v47 }
 0x15a   :  { %v2379_v54 = vadd.f32 %v1951_v52, %v1887_v49 }
 0x15b   :  { %v1968_v56 = vpop.f32.mrb[32].mxu0 }
 0x15c   :  { %v2032_v57 = vpop.f32.mrb[32].mxu1  ;;  %v1969_v58 = vpop.f32.mrb[33].mxu0 }
 0x15d   :  { %v1970_v59 = vadd.f32 %v1969_v58, %v1968_v56  ;;  %v2033_v60 = vpop.f32.mrb[33].mxu1  ;;  %v1971_v61 = vpop.f32.mrb[34].mxu0 }
 0x15e   :  { %v2034_v62 = vadd.f32 %v2033_v60, %v2032_v57  ;;  %v2035_v63 = vpop.f32.mrb[34].mxu1  ;;  %v1972_v0 = vpop.f32.mrb[35].mxu0 }
 0x15f   :  { %v1207_v1 = vadd.f32 %v1970_v59, %v2349_v11  ;;  %v1973_v2 = vadd.f32 %v1972_v0, %v1971_v61  ;;  %v2036_v4 = vpop.f32.mrb[35].mxu1 }
 0x160   :  { %v2037_v7 = vadd.f32 %v2036_v4, %v2035_v63 }
 0x161   :  { %v1304_v8 = vadd.f32 %v2034_v62, %v1207_v1  ;;  %v1210_v9 = vadd.f32 %v1973_v2, %v2351_v13 }
 0x163   :  { %v1424_v10 = vadd.f32 %v2385_v6, %v1304_v8  ;;  %v1307_v12 = vadd.f32 %v2037_v7, %v1210_v9  ;;  %v1974_v14 = vpop.f32.mrb[36].mxu0 }
 0x164   :  { %v2038_v15 = vpop.f32.mrb[36].mxu1  ;;  %v1975_v16 = vpop.f32.mrb[37].mxu0 }
 0x165   :  { %v1807_v17 = vmul.f32 -1.442695, %v1424_v10  ;;  %v1425_v11 = vadd.f32 %v2385_v6, %v1307_v12  ;;  %v1976_v18 = vadd.f32 %v1975_v16, %v1974_v14  ;;  %v2039_v20 = vpop.f32.mrb[37].mxu1  ;;  %v1977_v22 = vpop.f32.mrb[38].mxu0 }
 0x166   :  { %v2040_v23 = vadd.f32 %v2039_v20, %v2038_v15  ;;  %v2041_v24 = vpop.f32.mrb[38].mxu1  ;;  %v1978_v26 = vpop.f32.mrb[39].mxu0 }
 0x167   :  { %2150 = vpow2.f32 %v1807_v17  ;;  %v1808_v28 = vmul.f32 -1.442695, %v1425_v11  ;;  %v1215_v29 = vadd.f32 %v1976_v18, %v2353_v25  ;;  %v1979_v13 = vadd.f32 %v1978_v26, %v1977_v22  ;;  %v2042_v30 = vpop.f32.mrb[39].mxu1 }
 0x168   :  { %v2043_v31 = vadd.f32 %v2042_v30, %v2041_v24 }
 0x169   :  { %2152 = vpow2.f32 %v1808_v28  ;;  %v1312_v32 = vadd.f32 %v2040_v23, %v1215_v29  ;;  %v1218_v33 = vadd.f32 %v1979_v13, %v2355_v27 }
 0x16b   :  { %v1426_v34 = vadd.f32 %v2385_v6, %v1312_v32  ;;  %v1315_v36 = vadd.f32 %v2043_v31, %v1218_v33  ;;  %v1980_v38 = vpop.f32.mrb[40].mxu0 }
 0x16c   :  { %v2044_v40 = vpop.f32.mrb[40].mxu1  ;;  %v1981_v42 = vpop.f32.mrb[41].mxu0 }
 0x16d   :  { %v1809_v43 = vmul.f32 -1.442695, %v1426_v34  ;;  %v1427_v44 = vadd.f32 %v2385_v6, %v1315_v36  ;;  %v1982_v45 = vadd.f32 %v1981_v42, %v1980_v38  ;;  %v2045_v46 = vpop.f32.mrb[41].mxu1  ;;  %v1983_v47 = vpop.f32.mrb[42].mxu0 }
 0x16e   :  { %v2046_v25 = vadd.f32 %v2045_v46, %v2044_v40  ;;  %v2047_v48 = vpop.f32.mrb[42].mxu1  ;;  %v1984_v49 = vpop.f32.mrb[43].mxu0 }
 0x16f   :  { %2154 = vpow2.f32 %v1809_v43  ;;  %v1810_v50 = vmul.f32 -1.442695, %v1427_v44  ;;  %v1223_v52 = vadd.f32 %v1982_v45, %v2357_v39  ;;  %v1985_v27 = vadd.f32 %v1984_v49, %v1983_v47  ;;  %v2048_v56 = vpop.f32.mrb[43].mxu1 }
 0x170   :  { %v2049_v57 = vadd.f32 %v2048_v56, %v2047_v48 }
 0x171   :  { %v2151_v58 = vpop.eup %2150  ;;  %2156 = vpow2.f32 %v1810_v50  ;;  %v1320_v59 = vadd.f32 %v2046_v25, %v1223_v52  ;;  %v1226_v60 = vadd.f32 %v1985_v27, %v2359_v41 }
 0x172   :  { %v1488_v61 = vadd.f32 1.0, %v2151_v58 }
 0x173   :  { %v2153_v62 = vpop.eup %2152  ;;  %v1428_v63 = vadd.f32 %v2385_v6, %v1320_v59  ;;  %v1323_v0 = vadd.f32 %v2049_v57, %v1226_v60  ;;  %v1986_v1 = vpop.f32.mrb[44].mxu0 }
 0x174   :  { %v1489_v2 = vadd.f32 1.0, %v2153_v62  ;;  %v2050_v4 = vpop.f32.mrb[44].mxu1  ;;  %v1987_v7 = vpop.f32.mrb[45].mxu0  ;;  %2158 = vrcp.f32 %v1488_v61 }
 0x175   :  { %v1811_v8 = vmul.f32 -1.442695, %v1428_v63  ;;  %v1429_v39 = vadd.f32 %v2385_v6, %v1323_v0  ;;  %v1988_v9 = vadd.f32 %v1987_v7, %v1986_v1  ;;  %v2051_v10 = vpop.f32.mrb[45].mxu1  ;;  %v1989_v12 = vpop.f32.mrb[46].mxu0 }
 0x176   :  { %2160 = vrcp.f32 %v1489_v2  ;;  %v2052_v14 = vadd.f32 %v2051_v10, %v2050_v4  ;;  %v2053_v15 = vpop.f32.mrb[46].mxu1  ;;  %v1990_v41 = vpop.f32.mrb[47].mxu0 }
 0x177   :  { %2162 = vpow2.f32 %v1811_v8  ;;  %v1812_v16 = vmul.f32 -1.442695, %v1429_v39  ;;  %v1231_v17 = vadd.f32 %v1988_v9, %v2361_v53  ;;  %v1991_v11 = vadd.f32 %v1990_v41, %v1989_v12  ;;  %v2054_v18 = vpop.f32.mrb[47].mxu1 }
 0x178   :  { %v2055_v20 = vadd.f32 %v2054_v18, %v2053_v15 }
 0x179   :  { %v2155_v22 = vpop.eup %2154  ;;  %2164 = vpow2.f32 %v1812_v16  ;;  %v1328_v23 = vadd.f32 %v2052_v14, %v1231_v17  ;;  %v1234_v24 = vadd.f32 %v1991_v11, %v2363_v55 }
 0x17a   :  { %v1490_v26 = vadd.f32 1.0, %v2155_v22 }
 0x17b   :  { %v2157_v28 = vpop.eup %2156  ;;  %v1430_v29 = vadd.f32 %v2385_v6, %v1328_v23  ;;  %v1331_v13 = vadd.f32 %v2055_v20, %v1234_v24  ;;  %v1992_v30 = vpop.f32.mrb[48].mxu0 }
 0x17c   :  { %v1491_v31 = vadd.f32 1.0, %v2157_v28  ;;  %v2056_v32 = vpop.f32.mrb[48].mxu1  ;;  %v1993_v33 = vpop.f32.mrb[49].mxu0  ;;  %2166 = vrcp.f32 %v1490_v26 }
 0x17d   :  { %v1813_v34 = vmul.f32 -1.442695, %v1430_v29  ;;  %v1431_v53 = vadd.f32 %v2385_v6, %v1331_v13  ;;  %v1994_v36 = vadd.f32 %v1993_v33, %v1992_v30  ;;  %v2057_v38 = vpop.f32.mrb[49].mxu1  ;;  %v1995_v40 = vpop.f32.mrb[50].mxu0 }
 0x17e   :  { %v2159_v42 = vpop.eup %2158  ;;  %2168 = vrcp.f32 %v1491_v31  ;;  %v2058_v43 = vadd.f32 %v2057_v38, %v2056_v32  ;;  %v2059_v55 = vpop.f32.mrb[50].mxu1 }
 0x17f   :  { %v1996_v44 = vpop.f32.mrb[51].mxu0  ;;  %2170 = vpow2.f32 %v1813_v34  ;;  %v1814_v45 = vmul.f32 -1.442695, %v1431_v53  ;;  %v1239_v46 = vadd.f32 %v1994_v36, %v2365_v3  ;;  %v2060_v25 = vpop.f32.mrb[51].mxu1  ;;  %v1536_v50 = vadd.f32 1e-08, %v2159_v42 }
 0x180   :  { %v1997_v47 = vadd.f32 %v1996_v44, %v1995_v40  ;;  %v2161_v48 = vpop.eup %2160  ;;  %v2061_v49 = vadd.f32 %v2060_v25, %v2059_v55 }
 0x181   :  { %v2163_v52 = vpop.eup %2162  ;;  %2172 = vpow2.f32 %v1814_v45  ;;  %v1336_v27 = vadd.f32 %v2058_v43, %v1239_v46  ;;  %v1537_v57 = vadd.f32 1e-08, %v2161_v48 }
 0x182   :  { %v1242_v56 = vadd.f32 %v1997_v47, %v2367_v5  ;;  %v1492_v58 = vadd.f32 1.0, %v2163_v52  ;;  %2174 = vlog2.f32 %v1536_v50 }
 0x183   :  { %v2165_v59 = vpop.eup %2164  ;;  %v1432_v60 = vadd.f32 %v2385_v6, %v1336_v27  ;;  %v1998_v62 = vpop.f32.mrb[52].mxu0  ;;  %2176 = vlog2.f32 %v1537_v57 }
 0x184   :  { %v1339_v61 = vadd.f32 %v2061_v49, %v1242_v56  ;;  %2178 = vrcp.f32 %v1492_v58  ;;  %v1493_v3 = vadd.f32 1.0, %v2165_v59  ;;  %v2062_v63 = vpop.f32.mrb[52].mxu1  ;;  %v1999_v0 = vpop.f32.mrb[53].mxu0  ;;  %v2414_v49 = vld [vmem:[%s2506_s3] ss:$0 sm:$0xff] }
 0x185   :  { %v1815_v1 = vmul.f32 -1.442695, %v1432_v60  ;;  %v2000_v4 = vadd.f32 %v1999_v0, %v1998_v62  ;;  %v2063_v7 = vpop.f32.mrb[53].mxu1  ;;  %v2001_v8 = vpop.f32.mrb[54].mxu0 }
 0x186   :  { %v1433_v2 = vadd.f32 %v2385_v6, %v1339_v61  ;;  %v2167_v5 = vpop.eup %2166  ;;  %2180 = vrcp.f32 %v1493_v3  ;;  %v2064_v39 = vadd.f32 %v2063_v7, %v2062_v63  ;;  %v2065_v9 = vpop.f32.mrb[54].mxu1 }
 0x187   :  { %v2002_v10 = vpop.f32.mrb[55].mxu0  ;;  %2182 = vpow2.f32 %v1815_v1  ;;  %v1247_v14 = vadd.f32 %v2000_v4, %v2369_v19  ;;  %v2066_v41 = vpop.f32.mrb[55].mxu1  ;;  %v1538_v11 = vadd.f32 1e-08, %v2167_v5 }
 0x188   :  { %v1816_v12 = vmul.f32 -1.442695, %v1433_v2  ;;  %v2003_v15 = vadd.f32 %v2002_v10, %v2001_v8  ;;  %v2169_v16 = vpop.eup %2168  ;;  %v2067_v17 = vadd.f32 %v2066_v41, %v2065_v9 }
 0x189   :  { %v2171_v18 = vpop.eup %2170  ;;  %v1344_v20 = vadd.f32 %v2064_v39, %v1247_v14  ;;  %v1539_v23 = vadd.f32 1e-08, %v2169_v16 }
 0x18a   :  { %2184 = vpow2.f32 %v1816_v12  ;;  %v1250_v22 = vadd.f32 %v2003_v15, %v2371_v21  ;;  %v1494_v24 = vadd.f32 1.0, %v2171_v18 }
 0x18b   :  { %2186 = vlog2.f32 %v1538_v11  ;;  %v2173_v26 = vpop.eup %2172  ;;  %v1434_v28 = vadd.f32 %v2385_v6, %v1344_v20  ;;  %v2004_v13 = vpop.f32.mrb[56].mxu0 }
 0x18c   :  { %v1347_v29 = vadd.f32 %v2067_v17, %v1250_v22  ;;  %2188 = vlog2.f32 %v1539_v23  ;;  %v2175_v19 = vpop.eup %2174  ;;  %v1495_v30 = vadd.f32 1.0, %v2173_v26  ;;  %v2068_v31 = vpop.f32.mrb[56].mxu1 }
 0x18d   :  { %2190 = vrcp.f32 %v1494_v24  ;;  %v2005_v32 = vpop.f32.mrb[57].mxu0  ;;  %v2177_v33 = vpop.eup %2176  ;;  %v1817_v34 = vmul.f32 -1.442695, %v1434_v28  ;;  %v1553_v40 = vmul.f32 0.6931472, %v2175_v19 }
 0x18e   :  { %v1435_v53 = vadd.f32 %v2385_v6, %v1347_v29  ;;  %v2006_v36 = vadd.f32 %v2005_v32, %v2004_v13  ;;  %v2069_v21 = vpop.f32.mrb[57].mxu1  ;;  %v2007_v38 = vpop.f32.mrb[58].mxu0  ;;  %2192 = vrcp.f32 %v1495_v30  ;;  %v1555_v45 = vmul.f32 0.6931472, %v2177_v33 }
 0x18f   :  { %v2179_v42 = vpop.eup %2178  ;;  %v2070_v43 = vadd.f32 %v2069_v21, %v2068_v31  ;;  %v2071_v55 = vpop.f32.mrb[58].mxu1  ;;  %2194 = vpow2.f32 %v1817_v34  ;;  %v1584_v27 = vsub.f32 0.0, %v1553_v40 }
 0x190   :  { %v2008_v44 = vpop.f32.mrb[59].mxu0  ;;  %v1818_v46 = vmul.f32 -1.442695, %v1435_v53  ;;  %v1255_v47 = vadd.f32 %v2006_v36, %v2373_v35  ;;  %v2072_v48 = vpop.f32.mrb[59].mxu1  ;;  %v1540_v56 = vadd.f32 1e-08, %v2179_v42 }
 0x191   :  { %v2009_v25 = vadd.f32 %v2008_v44, %v2007_v38  ;;  %v2181_v50 = vpop.eup %2180  ;;  %v2073_v52 = vadd.f32 %v2072_v48, %v2071_v55  ;;  %v1607_v35 = vmul.f32 %v2414_v49, %v1584_v27  ;;  %v1585_v62 = vsub.f32 0.0, %v1555_v45 }
 0x192   :  { %v2183_v57 = vpop.eup %2182  ;;  %2196 = vpow2.f32 %v1818_v46  ;;  %v1352_v58 = vadd.f32 %v2070_v43, %v1255_v47  ;;  %v1541_v60 = vadd.f32 1e-08, %v2181_v50 }
 0x193   :  { %v1258_v59 = vadd.f32 %v2009_v25, %v2375_v37  ;;  %v1496_v61 = vadd.f32 1.0, %v2183_v57  ;;  %2198 = vlog2.f32 %v1540_v56  ;;  %v2010_v1 = vpop.f32.mrb[60].mxu0  ;;  %1623 = vadd.xlane.f32.xlu0 %v1607_v35  ;;  %v1608_v11 = vmul.f32 %v2414_v49, %v1585_v62 }
 0x194   :  { %v2185_v3 = vpop.eup %2184  ;;  %v1436_v63 = vadd.f32 %v2385_v6, %v1352_v58  ;;  %2200 = vlog2.f32 %v1541_v60  ;;  %v2074_v7 = vpop.f32.mrb[60].mxu1 }
 0x195   :  { %v1355_v0 = vadd.f32 %v2073_v52, %v1258_v59  ;;  %v2187_v2 = vpop.eup %2186  ;;  %2202 = vrcp.f32 %v1496_v61  ;;  %v1497_v4 = vadd.f32 1.0, %v2185_v3  ;;  %v2011_v8 = vpop.f32.mrb[61].mxu0 }
 0x196   :  { %v2189_v5 = vpop.eup %2188  ;;  %v1819_v37 = vmul.f32 -1.442695, %v1436_v63  ;;  %v2012_v9 = vadd.f32 %v2011_v8, %v2010_v1  ;;  %v2075_v10 = vpop.f32.mrb[61].mxu1  ;;  %v1557_v14 = vmul.f32 0.6931472, %v2187_v2 }
 0x197   :  { %v1437_v39 = vadd.f32 %v2385_v6, %v1355_v0  ;;  %v2013_v12 = vpop.f32.mrb[62].mxu0  ;;  %v2191_v15 = vpop.eup %2190  ;;  %2204 = vrcp.f32 %v1497_v4  ;;  %v2076_v41 = vadd.f32 %v2075_v10, %v2074_v7  ;;  %v1559_v18 = vmul.f32 0.6931472, %v2189_v5  ;;  %1625 = vadd.xlane.f32.xlu0 %v1608_v11 }
 0x198   :  { %v2077_v16 = vpop.f32.mrb[62].mxu1  ;;  %v2014_v17 = vpop.f32.mrb[63].mxu0  ;;  %2206 = vpow2.f32 %v1819_v37  ;;  %v1263_v22 = vadd.f32 %v2012_v9, %v2377_v51  ;;  %v1586_v29 = vsub.f32 0.0, %v1557_v14  ;;  %v1542_v13 = vadd.f32 1e-08, %v2191_v15 }
 0x199   :  { %v1820_v20 = vmul.f32 -1.442695, %v1437_v39  ;;  %v2015_v23 = vadd.f32 %v2014_v17, %v2013_v12  ;;  %v2078_v24 = vpop.f32.mrb[63].mxu1  ;;  %v2193_v26 = vpop.eup %2192  ;;  %v1587_v53 = vsub.f32 0.0, %v1559_v18 }
 0x19a   :  { %v2079_v28 = vadd.f32 %v2078_v24, %v2077_v16  ;;  %v2195_v19 = vpop.eup %2194  ;;  %v1360_v30 = vadd.f32 %v2076_v41, %v1263_v22  ;;  %v1543_v32 = vadd.f32 1e-08, %v2193_v26  ;;  %v1609_v34 = vmul.f32 %v2414_v49, %v1586_v29 }
 0x19b   :  { %2208 = vpow2.f32 %v1820_v20  ;;  %v1266_v31 = vadd.f32 %v2015_v23, %v2379_v54  ;;  %v1498_v33 = vadd.f32 1.0, %v2195_v19  ;;  %v1610_v45 = vmul.f32 %v2414_v49, %v1587_v53 }
 0x19c   :  { %2210 = vlog2.f32 %v1542_v13  ;;  %v2197_v36 = vpop.eup %2196  ;;  %v1438_v51 = vadd.f32 %v2385_v6, %v1360_v30  ;;  %1627 = vadd.xlane.f32.xlu1 %v1609_v34 }
 0x19d   :  { %v1363_v21 = vadd.f32 %v2079_v28, %v1266_v31  ;;  %2212 = vlog2.f32 %v1543_v32  ;;  %v2199_v38 = vpop.eup %2198  ;;  %v1499_v40 = vadd.f32 1.0, %v2197_v36 }
 0x19e   :  { %2214 = vrcp.f32 %v1498_v33  ;;  %v2201_v42 = vpop.eup %2200  ;;  %v1821_v43 = vmul.f32 -1.442695, %v1438_v51  ;;  %v1561_v54 = vmul.f32 0.6931472, %v2199_v38 }
 0x19f   :  { %v1439_v55 = vadd.f32 %v2385_v6, %v1363_v21  ;;  %v2203_v44 = vpop.eup %2202  ;;  %2216 = vrcp.f32 %v1499_v40  ;;  %v1563_v46 = vmul.f32 0.6931472, %v2201_v42 }
 0x1a0   :  { %2218 = vpow2.f32 %v1821_v43  ;;  %v1588_v25 = vsub.f32 0.0, %v1561_v54  ;;  %v1544_v48 = vadd.f32 1e-08, %v2203_v44  ;;  %1629 = vadd.xlane.f32.xlu1 %v1610_v45 }
 0x1a1   :  { %v1822_v47 = vmul.f32 -1.442695, %v1439_v55  ;;  %v2205_v50 = vpop.eup %2204  ;;  %v1589_v52 = vsub.f32 0.0, %v1563_v46 }
 0x1a2   :  { %v2207_v27 = vpop.eup %2206  ;;  %v1611_v56 = vmul.f32 %v2414_v49, %v1588_v25  ;;  %v1545_v57 = vadd.f32 1e-08, %v2205_v50 }
 0x1a3   :  { %2220 = vpow2.f32 %v1822_v47  ;;  %v1500_v58 = vadd.f32 1.0, %v2207_v27  ;;  %v1612_v6 = vmul.f32 %v2414_v49, %v1589_v52 }
 0x1a4   :  { %2222 = vlog2.f32 %v1544_v48  ;;  %1631 = vadd.xlane.f32.xlu0 %v1611_v56 }
 0x1a5   :  { %v2209_v59 = vpop.eup %2208  ;;  %2224 = vlog2.f32 %v1545_v57  ;;  %1633 = vadd.xlane.f32.xlu1 %v1612_v6 }
 0x1a6   :  { %v2211_v60 = vpop.eup %2210  ;;  %2226 = vrcp.f32 %v1500_v58  ;;  %v1501_v61 = vadd.f32 1.0, %v2209_v59 }
 0x1a7   :  { %v2213_v35 = vpop.eup %2212  ;;  %v1565_v62 = vmul.f32 0.6931472, %v2211_v60 }
 0x1a8   :  { %v2215_v3 = vpop.eup %2214  ;;  %2228 = vrcp.f32 %v1501_v61  ;;  %v1567_v63 = vmul.f32 0.6931472, %v2213_v35 }
 0x1a9   :  { %v1590_v0 = vsub.f32 0.0, %v1565_v62  ;;  %v1546_v1 = vadd.f32 1e-08, %v2215_v3  ;;  %v2217_v2 = vpop.eup %2216 }
 0x1aa   :  { %v1591_v4 = vsub.f32 0.0, %v1567_v63  ;;  %v2219_v7 = vpop.eup %2218  ;;  %v1547_v5 = vadd.f32 1e-08, %v2217_v2 }
 0x1ab   :  { %v1613_v8 = vmul.f32 %v2414_v49, %v1590_v0  ;;  %2230 = vlog2.f32 %v1546_v1  ;;  %v1502_v37 = vadd.f32 1.0, %v2219_v7 }
 0x1ac   :  { %v1614_v39 = vmul.f32 %v2414_v49, %v1591_v4  ;;  %2232 = vlog2.f32 %v1547_v5 }
 0x1ad   :  { %v2221_v9 = vpop.eup %2220  ;;  %1635 = vadd.xlane.f32.xlu0 %v1613_v8  ;;  %2234 = vrcp.f32 %v1502_v37 }
 0x1ae   :  { %v2223_v10 = vpop.eup %2222  ;;  %v1503_v12 = vadd.f32 1.0, %v2221_v9  ;;  %1637 = vadd.xlane.f32.xlu1 %v1614_v39 }
 0x1af   :  { %v2225_v14 = vpop.eup %2224  ;;  %v1569_v15 = vmul.f32 0.6931472, %v2223_v10 }
 0x1b0   :  { %v2227_v41 = vpop.eup %2226  ;;  %2236 = vrcp.f32 %v1503_v12  ;;  %v1571_v16 = vmul.f32 0.6931472, %v2225_v14 }
 0x1b1   :  { %v1592_v17 = vsub.f32 0.0, %v1569_v15  ;;  %v1548_v11 = vadd.f32 1e-08, %v2227_v41 }
 0x1b2   :  { %v2229_v18 = vpop.eup %2228  ;;  %v1593_v20 = vsub.f32 0.0, %v1571_v16 }
 0x1b3   :  { %v1615_v22 = vmul.f32 %v2414_v49, %v1592_v17  ;;  %2238 = vlog2.f32 %v1548_v11  ;;  %v1549_v23 = vadd.f32 1e-08, %v2229_v18 }
 0x1b4   :  { %v1616_v24 = vmul.f32 %v2414_v49, %v1593_v20 }
 0x1b5   :  { %v2231_v26 = vpop.eup %2230  ;;  %1639 = vadd.xlane.f32.xlu0 %v1615_v22  ;;  %2240 = vlog2.f32 %v1549_v23 }
 0x1b6   :  { %1641 = vadd.xlane.f32.xlu1 %v1616_v24  ;;  %v1573_v28 = vmul.f32 0.6931472, %v2231_v26  ;;  %v2233_v29 = vpop.eup %2232 }
 0x1b7   :  { %v2235_v13 = vpop.eup %2234  ;;  %v1575_v30 = vmul.f32 0.6931472, %v2233_v29 }
 0x1b8   :  { %v1594_v19 = vsub.f32 0.0, %v1573_v28  ;;  %v1550_v31 = vadd.f32 1e-08, %v2235_v13 }
 0x1b9   :  { %v1595_v34 = vsub.f32 0.0, %v1575_v30 }
 0x1ba   :  { %v2237_v32 = vpop.eup %2236  ;;  %v1617_v33 = vmul.f32 %v2414_v49, %v1594_v19  ;;  %2242 = vlog2.f32 %v1550_v31 }
 0x1bb   :  { %v1551_v53 = vadd.f32 1e-08, %v2237_v32  ;;  %v1618_v36 = vmul.f32 %v2414_v49, %v1595_v34 }
 0x1bc   :  { %1643 = vadd.xlane.f32.xlu0 %v1617_v33 }
 0x1bd   :  { %v2239_v51 = vpop.eup %2238  ;;  %2244 = vlog2.f32 %v1551_v53  ;;  %1645 = vadd.xlane.f32.xlu1 %v1618_v36 }
 0x1be   :  { %v1577_v21 = vmul.f32 0.6931472, %v2239_v51 }
 0x1bf   :  { %v2241_v38 = vpop.eup %2240 }
 0x1c0   :  { %v1596_v40 = vsub.f32 0.0, %v1577_v21  ;;  %v1579_v42 = vmul.f32 0.6931472, %v2241_v38 }
 0x1c2   :  { %v1619_v43 = vmul.f32 %v2414_v49, %v1596_v40  ;;  %v1597_v55 = vsub.f32 0.0, %v1579_v42 }
 0x1c4   :  { %1647 = vadd.xlane.f32.xlu0 %v1619_v43  ;;  %v1620_v54 = vmul.f32 %v2414_v49, %v1597_v55  ;;  %v2243_v44 = vpop.eup %2242 }
 0x1c5   :  { %v1581_v45 = vmul.f32 0.6931472, %v2243_v44 }
 0x1c6   :  { %1649 = vadd.xlane.f32.xlu1 %v1620_v54 }
 0x1c7   :  { %v2245_v46 = vpop.eup %2244  ;;  %v1598_v47 = vsub.f32 0.0, %v1581_v45 }
 0x1c8   :  { %v1583_v25 = vmul.f32 0.6931472, %v2245_v46 }
 0x1c9   :  { %v1621_v48 = vmul.f32 %v2414_v49, %v1598_v47 }
 0x1ca   :  { %v1599_v50 = vsub.f32 0.0, %v1583_v25 }
 0x1cb   :  { %1651 = vadd.xlane.f32.xlu0 %v1621_v48 }
 0x1cc   :  { %v1622_v52 = vmul.f32 %v2414_v49, %v1599_v50 }
 0x1ce   :  { %1653 = vadd.xlane.f32.xlu1 %v1622_v52 }
 0x220   :  { %v1624_v27 = vpop.xlane.xlu0 %1623 }
 0x221   :  { %1656 = vst.msk [vmem:[%s2507_s4] sm:$0xff] %vm1655_vm0, %v1624_v27 }
 0x224   :  { %v1626_v56 = vpop.xlane.xlu0 %1625 }
 0x225   :  { %1657 = vst.msk [vmem:[%s2507_s4 + $0x8] sm:$0xff] %vm1655_vm0, %v1626_v56 }
 0x229   :  { %v1628_v57 = vpop.xlane.xlu1 %1627 }
 0x22a   :  { %1658 = vst.msk [vmem:[%s2507_s4 + $0x10] sm:$0xff] %vm1655_vm0, %v1628_v57 }
 0x22d   :  { %v1630_v49 = vpop.xlane.xlu1 %1629 }
 0x22e   :  { %1659 = vst.msk [vmem:[%s2507_s4 + $0x18] sm:$0xff] %vm1655_vm0, %v1630_v49 }
 0x231   :  { %v1632_v58 = vpop.xlane.xlu0 %1631 }
 0x232   :  { %1660 = vst.msk [vmem:[%s2507_s4 + $0x20] sm:$0xff] %vm1655_vm0, %v1632_v58  ;;  %v1634_v6 = vpop.xlane.xlu1 %1633 }
 0x233   :  { %1661 = vst.msk [vmem:[%s2507_s4 + $0x28] sm:$0xff] %vm1655_vm0, %v1634_v6 }
 0x23a   :  { %v1636_v59 = vpop.xlane.xlu0 %1635 }
 0x23b   :  { %1662 = vst.msk [vmem:[%s2507_s4 + $0x30] sm:$0xff] %vm1655_vm0, %v1636_v59  ;;  %v1638_v60 = vpop.xlane.xlu1 %1637 }
 0x23c   :  { %1663 = vst.msk [vmem:[%s2507_s4 + $0x38] sm:$0xff] %vm1655_vm0, %v1638_v60 }
 0x242   :  { %v1640_v61 = vpop.xlane.xlu0 %1639 }
 0x243   :  { %1664 = vst.msk [vmem:[%s2507_s4 + $0x40] sm:$0xff] %vm1655_vm0, %v1640_v61  ;;  %v1642_v35 = vpop.xlane.xlu1 %1641 }
 0x244   :  { %1665 = vst.msk [vmem:[%s2507_s4 + $0x48] sm:$0xff] %vm1655_vm0, %v1642_v35 }
 0x249   :  { %v1644_v62 = vpop.xlane.xlu0 %1643 }
 0x24a   :  { %1666 = vst.msk [vmem:[%s2507_s4 + $0x50] sm:$0xff] %vm1655_vm0, %v1644_v62  ;;  %v1646_v3 = vpop.xlane.xlu1 %1645 }
 0x24b   :  { %1667 = vst.msk [vmem:[%s2507_s4 + $0x58] sm:$0xff] %vm1655_vm0, %v1646_v3 }
 0x251   :  { %v1648_v63 = vpop.xlane.xlu0 %1647 }
 0x252   :  { %1668 = vst.msk [vmem:[%s2507_s4 + $0x60] sm:$0xff] %vm1655_vm0, %v1648_v63 }
 0x253   :  { %v1650_v0 = vpop.xlane.xlu1 %1649 }
 0x254   :  { %1669 = vst.msk [vmem:[%s2507_s4 + $0x68] sm:$0xff] %vm1655_vm0, %v1650_v0 }
 0x258   :  { %v1652_v1 = vpop.xlane.xlu0 %1651 }
 0x259   :  { %1670 = vst.msk [vmem:[%s2507_s4 + $0x70] sm:$0xff] %vm1655_vm0, %v1652_v1 }
 0x25b   :  { %v1654_v2 = vpop.xlane.xlu1 %1653 }
 0x25c   :  { %1671 = vst.msk [vmem:[%s2507_s4 + $0x78] sm:$0xff] %vm1655_vm0, %v1654_v2 }
 0x25d   :  { %1676 = vsyncpa [#allocation4], 1 }
 0x25e   :  { %1677 = vsyncpa [#allocation6], 1 }

</bundles_post_ra>
